<compile_context>
chip_gen: v6e
topology: v6e:2x2x1
jax: 0.10.0
libtpu: 0.0.40
codegen_flags: <defaults>
</compile_context>

<pallas_src>
import functools

import jax
import jax.numpy as jnp
import numpy as np
from jax.experimental import pallas as pl
from jax.experimental.pallas import tpu as pltpu

_LANE = 128
_TARGET_TILE_BYTES = 2 * 1024 * 1024     # ~2 MiB input tiles (>=85% HBM roofline)
_VMEM_LIMIT_BYTES = 32 * 1024 * 1024     # within physical VMEM on v5e/v6e/v7x


# ---------------------------------------------------------------------------
# Kernel 1: fused global average pool + gate computation.
#   grid = (B, n_hw_tiles); spatial axis is the ("arbitrary") reduction axis.
#   Per tile: VPU add into a (1, C, T) f32 scratch accumulator.
#   Finalize: single lane reduce -> (1,C)@(C,Cr) -> ReLU -> (Cr,C) -> sigmoid.
# ---------------------------------------------------------------------------
def _pool_gate_kernel(x_ref, w1_ref, b1_ref, w2_ref, b2_ref, g_ref, acc_ref,
                      *, hw, tile, inv_hw):
    t = pl.program_id(1)

    @pl.when(t == 0)
    def _():
        acc_ref[...] = jnp.zeros_like(acc_ref)

    x = x_ref[...].astype(jnp.float32)                      # (1, C, T)
    if hw % tile != 0:
        # Ragged tail tile: out-of-bounds lanes hold unspecified data -> mask.
        pos = t * tile + jax.lax.broadcasted_iota(jnp.int32, x.shape, 2)
        x = jnp.where(pos < hw, x, 0.0)
    acc_ref[...] += x                                        # VPU adds only

    @pl.when(t == pl.num_programs(1) - 1)
    def _():
        pooled = jnp.sum(acc_ref[...], axis=-1) * inv_hw     # (1, C)
        h = jnp.dot(pooled, w1_ref[...], preferred_element_type=jnp.float32)
        h = jnp.maximum(h + b1_ref[...], 0.0)                # (1, Cr)
        g = jnp.dot(h, w2_ref[...], preferred_element_type=jnp.float32)
        g = jax.nn.sigmoid(g + b2_ref[...])                  # (1, C)
        g_ref[...] = g[:, None, :]                           # (1, 1, C)


# ---------------------------------------------------------------------------
# Kernel 2: row-packed channel-gating broadcast multiply over x viewed as
#   (B*C, HW); gate viewed as (B*C, 1).  Pure HBM-bound streaming pass.
# ---------------------------------------------------------------------------
def _scale_kernel(x_ref, g_ref, o_ref):
    o_ref[...] = (x_ref[...] * g_ref[...]).astype(o_ref.dtype)


# ---------------------------------------------------------------------------
# Tile pickers (byte-target based; partial last blocks are allowed).
# ---------------------------------------------------------------------------
def _pick_lane_tile(hw, row_bytes):
    """Lane tile (multiple of 128) targeting ~_TARGET_TILE_BYTES per tile."""
    groups = pl.cdiv(hw, _LANE)
    g = max(1, _TARGET_TILE_BYTES // (row_bytes * _LANE))
    g = min(g, groups)
    tile = g * _LANE
    return tile, pl.cdiv(hw, tile)


def _pick_row_tile(rows):
    """Row (sublane) tile: multiple of 8 (or full extent when rows < 8)."""
    if rows < 8:
        return rows
    if rows % 8 != 0:
        return 8           # partial last row block handled by Pallas
    return min(rows, 256)


def dse_forward(x, w1, bn1, w2, bn2, *, eps=1e-5):
    """x: (B, C, H, W).  w1: (Cr, C), w2: (C, Cr) (1x1 conv weights with the
    kernel dims squeezed).  bn1/bn2: dicts with gamma, beta, mean, var."""
    B, C, H, W = x.shape
    Cr = w1.shape[0]
    HW = H * W
    rows = B * C
    itemsize = jnp.dtype(x.dtype).itemsize

    # Fold eval-mode BN into the conv weights (scale) and bias vectors.
    s1 = bn1["gamma"] / jnp.sqrt(bn1["var"] + eps)
    b1 = bn1["beta"] - bn1["mean"] * s1
    s2 = bn2["gamma"] / jnp.sqrt(bn2["var"] + eps)
    b2 = bn2["beta"] - bn2["mean"] * s2
    w1_eff = (w1.T * s1[None, :]).astype(jnp.float32)        # (C, Cr)
    w2_eff = (w2.T * s2[None, :]).astype(jnp.float32)        # (Cr, C)

    # ---- 1) fused avg-pool + gate: (B, C, HW) -> (B, 1, C) gate ----
    x3 = x.reshape(B, C, HW)                                 # free (contiguous)
    Tp, n_tp = _pick_lane_tile(HW, C * itemsize)
    gate = pl.pallas_call(
        functools.partial(_pool_gate_kernel, hw=HW, tile=Tp,
                          inv_hw=1.0 / float(HW)),
        out_shape=jax.ShapeDtypeStruct((B, 1, C), jnp.float32),
        grid_spec=pltpu.PrefetchScalarGridSpec(
            num_scalar_prefetch=0,
            grid=(B, n_tp),
            in_specs=[
                pl.BlockSpec((1, C, Tp), lambda b, t: (b, 0, t)),
                pl.BlockSpec((C, Cr), lambda b, t: (0, 0)),
                pl.BlockSpec((1, Cr), lambda b, t: (0, 0)),
                pl.BlockSpec((Cr, C), lambda b, t: (0, 0)),
                pl.BlockSpec((1, C), lambda b, t: (0, 0)),
            ],
            out_specs=pl.BlockSpec((1, 1, C), lambda b, t: (b, 0, 0)),
            scratch_shapes=[pltpu.VMEM((1, C, Tp), jnp.float32)],
        ),
        compiler_params=pltpu.CompilerParams(
            dimension_semantics=("parallel", "arbitrary"),
            vmem_limit_bytes=_VMEM_LIMIT_BYTES),
    )(x3, w1_eff, b1.reshape(1, Cr), w2_eff, b2.reshape(1, C))

    # ---- 2) row-packed streaming multiply: (B*C, HW) * (B*C, 1) ----
    x2 = x.reshape(rows, HW)                                 # free (contiguous)
    R = _pick_row_tile(rows)
    Ts, n_ts = _pick_lane_tile(HW, R * itemsize)
    out = pl.pallas_call(
        _scale_kernel,
        out_shape=jax.ShapeDtypeStruct((rows, HW), x.dtype),
        grid_spec=pltpu.PrefetchScalarGridSpec(
            num_scalar_prefetch=0,
            grid=(pl.cdiv(rows, R), n_ts),
            in_specs=[
                pl.BlockSpec((R, Ts), lambda r, t: (r, t)),
                pl.BlockSpec((R, 1), lambda r, t: (r, 0)),
            ],
            out_specs=pl.BlockSpec((R, Ts), lambda r, t: (r, t)),
        ),
        compiler_params=pltpu.CompilerParams(
            dimension_semantics=("parallel", "parallel"),
            vmem_limit_bytes=_VMEM_LIMIT_BYTES),
    )(x2, gate.reshape(rows, 1))

    return out.reshape(B, C, H, W)


def dse_reference(x, w1, bn1, w2, bn2, *, eps=1e-5):
    pooled = jnp.mean(x, axis=(2, 3))                        # (B, C)
    s1 = bn1["gamma"] / jnp.sqrt(bn1["var"] + eps)
    b1 = bn1["beta"] - bn1["mean"] * s1
    s2 = bn2["gamma"] / jnp.sqrt(bn2["var"] + eps)
    b2 = bn2["beta"] - bn2["mean"] * s2
    h = jnp.maximum(pooled @ w1.T * s1 + b1, 0.0)            # (B, Cr)
    g = jax.nn.sigmoid(h @ w2.T * s2 + b2)                   # (B, C)
    return x * g[:, :, None, None]


if __name__ == "__main__":
    in_channel = 4
    reduction = 2
    B, C, H, W = 2, in_channel, 16, 16
    Cr = in_channel // reduction

    key = jax.random.PRNGKey(0)
    kx, kw1, kw2 = jax.random.split(key, 3)

    x = jax.random.normal(kx, (B, C, H, W), dtype=jnp.float32)

    # Conv2d weights (out, in, 1, 1) with kernel dims squeezed -> (out, in).
    w1 = jax.random.normal(kw1, (Cr, C), dtype=jnp.float32) * (1.0 / np.sqrt(C))
    w2 = jax.random.normal(kw2, (C, Cr), dtype=jnp.float32) * (1.0 / np.sqrt(Cr))

    # BatchNorm parameters at default PyTorch init (eval mode).
    bn1 = dict(gamma=jnp.ones((Cr,), jnp.float32), beta=jnp.zeros((Cr,), jnp.float32),
               mean=jnp.zeros((Cr,), jnp.float32), var=jnp.ones((Cr,), jnp.float32))
    bn2 = dict(gamma=jnp.ones((C,), jnp.float32), beta=jnp.zeros((C,), jnp.float32),
               mean=jnp.zeros((C,), jnp.float32), var=jnp.ones((C,), jnp.float32))

    out = dse_forward(x, w1, bn1, w2, bn2)
    out = jax.block_until_ready(out)

    ref = dse_reference(x, w1, bn1, w2, bn2)
    np.testing.assert_allclose(np.asarray(out), np.asarray(ref), rtol=1e-5, atol=1e-5)

    print("KERNEL_OK")
</pallas_src>

<mosaic_0001>
module attributes {stable_mosaic.version = 11 : i64} {
  func.func @_pool_gate_kernel(%arg0: i32, %arg1: i32, %arg2: memref<1x4x256xf32, #tpu.memory_space<vmem>>, %arg3: memref<4x2xf32, #tpu.memory_space<vmem>>, %arg4: memref<1x2xf32, #tpu.memory_space<vmem>>, %arg5: memref<2x4xf32, #tpu.memory_space<vmem>>, %arg6: memref<1x4xf32, #tpu.memory_space<vmem>>, %arg7: memref<1x1x4xf32, #tpu.memory_space<vmem>>, %arg8: memref<1x4x256xf32, #tpu.memory_space<vmem>>) attributes {dimension_semantics = [#tpu.dimension_semantics<parallel>, #tpu.dimension_semantics<arbitrary>], iteration_bounds = array<i64: 2, 1>, scalar_prefetch = 0 : i64, scratch_operands = 1 : i64, tpu.core_type = #tpu.core_type<tc>, window_params = [{transform_indices = @transform_0, window_bounds = array<i64: 1, 4, 256>}, {pipeline_mode = #tpu.pipeline_mode<synchronous>, transform_indices = @transform_1, window_bounds = array<i64: 4, 2>}, {pipeline_mode = #tpu.pipeline_mode<synchronous>, transform_indices = @transform_2, window_bounds = array<i64: 1, 2>}, {pipeline_mode = #tpu.pipeline_mode<synchronous>, transform_indices = @transform_3, window_bounds = array<i64: 2, 4>}, {pipeline_mode = #tpu.pipeline_mode<synchronous>, transform_indices = @transform_4, window_bounds = array<i64: 1, 4>}, {transform_indices = @transform_5, window_bounds = array<i64: 1, 1, 4>}]} {
    %c0_i32 = arith.constant 0 : i32
    %0 = arith.cmpi eq, %arg1, %c0_i32 : i32
    %1 = arith.extui %0 : i1 to i32
    %c0_i32_0 = arith.constant 0 : i32
    %2 = arith.cmpi ne, %1, %c0_i32_0 : i32
    scf.if %2 {
      %cst = arith.constant 0.000000e+00 : f32
      %10 = vector.broadcast %cst : f32 to vector<1x4x256xf32>
      %c0_11 = arith.constant 0 : index
      %c0_12 = arith.constant 0 : index
      %c0_13 = arith.constant 0 : index
      %11 = vector.load %arg8[%c0_11, %c0_12, %c0_13] : memref<1x4x256xf32, #tpu.memory_space<vmem>>, vector<1x4x256xf32>
      tpu.vector_store %arg8[%c0_11, %c0_12, %c0_13], %10 {strides = array<i32>} : memref<1x4x256xf32, #tpu.memory_space<vmem>>, vector<1x4x256xf32>,
    } else {
    }
    %c0 = arith.constant 0 : index
    %c0_1 = arith.constant 0 : index
    %c0_2 = arith.constant 0 : index
    %3 = vector.load %arg2[%c0, %c0_1, %c0_2] : memref<1x4x256xf32, #tpu.memory_space<vmem>>, vector<1x4x256xf32>
    %c0_3 = arith.constant 0 : index
    %c0_4 = arith.constant 0 : index
    %c0_5 = arith.constant 0 : index
    %4 = vector.load %arg8[%c0_3, %c0_4, %c0_5] : memref<1x4x256xf32, #tpu.memory_space<vmem>>, vector<1x4x256xf32>
    %5 = arith.addf %4, %3 : vector<1x4x256xf32>
    %c0_6 = arith.constant 0 : index
    %c0_7 = arith.constant 0 : index
    %c0_8 = arith.constant 0 : index
    %6 = vector.load %arg8[%c0_6, %c0_7, %c0_8] : memref<1x4x256xf32, #tpu.memory_space<vmem>>, vector<1x4x256xf32>
    tpu.vector_store %arg8[%c0_6, %c0_7, %c0_8], %5 {strides = array<i32>} : memref<1x4x256xf32, #tpu.memory_space<vmem>>, vector<1x4x256xf32>,
    %c0_i32_9 = arith.constant 0 : i32
    %7 = arith.cmpi eq, %arg1, %c0_i32_9 : i32
    %8 = arith.extui %7 : i1 to i32
    %c0_i32_10 = arith.constant 0 : i32
    %9 = arith.cmpi ne, %8, %c0_i32_10 : i32
    scf.if %9 {
      %c0_11 = arith.constant 0 : index
      %c0_12 = arith.constant 0 : index
      %c0_13 = arith.constant 0 : index
      %10 = vector.load %arg8[%c0_11, %c0_12, %c0_13] : memref<1x4x256xf32, #tpu.memory_space<vmem>>, vector<1x4x256xf32>
      %cst = arith.constant dense<0.000000e+00> : vector<1x4xf32>
      %11 = vector.multi_reduction <add>, %10, %cst [2] : vector<1x4x256xf32> to vector<1x4xf32>
      %cst_14 = arith.constant 3.906250e-03 : f32
      %12 = vector.broadcast %cst_14 : f32 to vector<1x4xf32>
      %13 = arith.mulf %11, %12 : vector<1x4xf32>
      %c0_15 = arith.constant 0 : index
      %c0_16 = arith.constant 0 : index
      %14 = vector.load %arg3[%c0_15, %c0_16] : memref<4x2xf32, #tpu.memory_space<vmem>>, vector<4x2xf32>
      %cst_17 = arith.constant dense<0.000000e+00> : vector<1x2xf32>
      %15 = tpu.matmul %13, %14, %cst_17 {dimension_numbers = #tpu.dot_dimension_numbers<[1], [0], [0], [1], [0, 0, 1, 1], [], []>} : vector<1x4xf32>, vector<4x2xf32>, vector<1x2xf32> -> vector<1x2xf32>
      %c0_18 = arith.constant 0 : index
      %c0_19 = arith.constant 0 : index
      %16 = vector.load %arg4[%c0_18, %c0_19] : memref<1x2xf32, #tpu.memory_space<vmem>>, vector<1x2xf32>
      %17 = arith.addf %15, %16 : vector<1x2xf32>
      %cst_20 = arith.constant 0.000000e+00 : f32
      %18 = vector.broadcast %cst_20 : f32 to vector<1x2xf32>
      %19 = arith.maximumf %17, %18 : vector<1x2xf32>
      %c0_21 = arith.constant 0 : index
      %c0_22 = arith.constant 0 : index
      %20 = vector.load %arg5[%c0_21, %c0_22] : memref<2x4xf32, #tpu.memory_space<vmem>>, vector<2x4xf32>
      %cst_23 = arith.constant dense<0.000000e+00> : vector<1x4xf32>
      %21 = tpu.matmul %19, %20, %cst_23 {dimension_numbers = #tpu.dot_dimension_numbers<[1], [0], [0], [1], [0, 0, 1, 1], [], []>} : vector<1x2xf32>, vector<2x4xf32>, vector<1x4xf32> -> vector<1x4xf32>
      %c0_24 = arith.constant 0 : index
      %c0_25 = arith.constant 0 : index
      %22 = vector.load %arg6[%c0_24, %c0_25] : memref<1x4xf32, #tpu.memory_space<vmem>>, vector<1x4xf32>
      %23 = arith.addf %21, %22 : vector<1x4xf32>
      %24 = arith.negf %23 : vector<1x4xf32>
      %25 = math.exp %24 : vector<1x4xf32>
      %cst_26 = arith.constant 1.000000e+00 : f32
      %26 = vector.broadcast %cst_26 : f32 to vector<1x4xf32>
      %27 = arith.addf %26, %25 : vector<1x4xf32>
      %28 = arith.divf %26, %27 : vector<1x4xf32>
      %29 = vector.shape_cast %28 : vector<1x4xf32> to vector<1x1x4xf32>
      %c0_27 = arith.constant 0 : index
      %c0_28 = arith.constant 0 : index
      %c0_29 = arith.constant 0 : index
      %30 = vector.load %arg7[%c0_27, %c0_28, %c0_29] : memref<1x1x4xf32, #tpu.memory_space<vmem>>, vector<1x1x4xf32>
      tpu.vector_store %arg7[%c0_27, %c0_28, %c0_29], %29 {strides = array<i32>} : memref<1x1x4xf32, #tpu.memory_space<vmem>>, vector<1x1x4xf32>,
    } else {
    }
    return
  }
  func.func @transform_0(%arg0: i32, %arg1: i32) -> (i32, i32, i32) {
    %c0_i32 = arith.constant 0 : i32
    %c0_i32_0 = arith.constant 0 : i32
    return %arg0, %c0_i32, %arg1 : i32, i32, i32
  }
  func.func @transform_1(%arg0: i32, %arg1: i32) -> (i32, i32) {
    %c0_i32 = arith.constant 0 : i32
    %c0_i32_0 = arith.constant 0 : i32
    %c0_i32_1 = arith.constant 0 : i32
    return %c0_i32, %c0_i32_0 : i32, i32
  }
  func.func @transform_2(%arg0: i32, %arg1: i32) -> (i32, i32) {
    %c0_i32 = arith.constant 0 : i32
    %c0_i32_0 = arith.constant 0 : i32
    %c0_i32_1 = arith.constant 0 : i32
    return %c0_i32, %c0_i32_0 : i32, i32
  }
  func.func @transform_3(%arg0: i32, %arg1: i32) -> (i32, i32) {
    %c0_i32 = arith.constant 0 : i32
    %c0_i32_0 = arith.constant 0 : i32
    %c0_i32_1 = arith.constant 0 : i32
    return %c0_i32, %c0_i32_0 : i32, i32
  }
  func.func @transform_4(%arg0: i32, %arg1: i32) -> (i32, i32) {
    %c0_i32 = arith.constant 0 : i32
    %c0_i32_0 = arith.constant 0 : i32
    %c0_i32_1 = arith.constant 0 : i32
    return %c0_i32, %c0_i32_0 : i32, i32
  }
  func.func @transform_5(%arg0: i32, %arg1: i32) -> (i32, i32, i32) {
    %c0_i32 = arith.constant 0 : i32
    %c0_i32_0 = arith.constant 0 : i32
    %c0_i32_1 = arith.constant 0 : i32
    return %arg0, %c0_i32, %c0_i32_0 : i32, i32, i32
  }
}

</mosaic_0001>

<bundles_post_ra>
// kernel: tpu_custom_call.1
= control target key start
LH: loop header
LB: loop body
LE: loop exit
PB: predicated region body
PF: predicated region fallthrough
CT: control target
= control target key end

     0   :  { %10 = vsyncpa [#allocation4], 0  ;;  %s942_s0 = inlined_call_operand.hbm [shape: f32[2,4,256], index: 0, kind: input, shape index: {}]   ;;  %s943_s1 = inlined_call_operand.vmem [shape: f32[4,2], index: 1, kind: input, shape index: {}]   ;;  %s944_s2 = inlined_call_operand.vmem [shape: f32[1,2], index: 2, kind: input, shape index: {}]   ;;  %s945_s3 = inlined_call_operand.vmem [shape: f32[2,4], index: 3, kind: input, shape index: {}]   ;;  %s946_s4 = inlined_call_operand.vmem [shape: f32[1,4], index: 4, kind: input, shape index: {}]   ;;  %s947_s5 = inlined_call_operand.hbm [shape: f32[2,1,4], index: 5, kind: output, shape index: {}]  }
   0x1   :  { %12 = vsyncpa [#allocation4 + $0x1], 0 }
   0x2   :  { %13 = vsyncpa [#allocation5], 0 }
   0x3   :  { %15 = vsyncpa [#allocation5 + $0x1], 0  ;;  %s789_s18 = smov 0   ;;  %s791_s19 = smov 0  }
   0x4   :  { %s793_s20 = smov 0   ;;  %s795_s21 = smov 0  }
   0x5   :  { %s797_s22 = smov 0   ;;  %s799_s23 = smov 0  }
   0x6 LB: > { %s544_s24 = sadd.s32 4294967295, %s753_s23   ;;  %s545_s25 = sadd.s32 4294967294, %s753_s23   ;;  %s753_s23 = sphi %s799_s23, %s21_s23   ;;  %s749_s22 = sphi %s797_s22, %s959_s22   ;;  %s745_s21 = sphi %s795_s21, %s958_s21   ;;  %s741_s20 = sphi %s793_s20, %s957_s20   ;;  %s737_s19 = sphi %s791_s19, %s956_s19   ;;  %s733_s18 = sphi %s789_s18, %s955_s18  }
   0x7   : > { %s33_s26 = sadd.s32 1, %s749_s22  ;;  %s42_s27 = sadd.s32 1, %s741_s20 }
   0x8   : > { %p35_p0 = scmp.ge.s32.totalorder %s33_s26, 2  ;;  %p49_p1 = scmp.ne.s32.totalorder %s741_s20, %s737_s19 }
   0x9   : > { %p50_p2 = scmp.eq.s32.totalorder %s753_s23, 0  ;;  %p55_p3 = scmp.ne.s32.totalorder %s737_s19, %s733_s18 }
   0xa   : > { %s961_s26 = smov (%p35_p0, %s33_s26), 0  ;;  %p56_p5 = scmp.eq.s32.totalorder %s544_s24, 0 }
   0xb   : > { %p830_p4 = por %p50_p2, %p49_p1  ;;  %s37_s29 = ssub.s32 %s749_s22, %s961_s26 }
   0xc   : > { %p163_p6 = scmp.eq.s32.totalorder %s544_s24, 1  ;;  %p40_p7 = scmp.eq.s32.totalorder %s37_s29, 0 }
   0xd   : > { %p836_p8 = por %p56_p5, %p55_p3  ;;  %p169_p10 = scmp.eq.s32.totalorder %s545_s25, 1 }
   0xe   : > { %p840_p9 = por %p163_p6, %p49_p1  ;;  %p588_p13 = scmp.lt.s32.totalorder %s753_s23, 2 }
   0xf   : > { %s845_s7 = scalar_select %p40_p7, %s741_s20, %s42_s27  }
  0x10   : > { %p847_p11 = por %p169_p10, %p55_p3  ;;  %s201_s9 = sand.u32 1, %s741_s20  }
  0x11   : > { %s548_s10 = sshll.u32 %s201_s9, 3  ;;  %s561_s11 = sshll.u32 %s749_s22, 7 }
  0x12   : > { %s951_s8 = scalar_select %p847_p11, 1, 0 }
  0x13   : > { %s213_s14 = scalar_lea.hbm %s942_s0, %s561_s11  ;;  %s205_s15 = scalar_lea.vmem [#allocation3], %s548_s10 }
  0x14   : > { %s215_s16 = sshll.u32 %s205_s15, 4  ;;  %p860_p0 = pnand %p588_p13, %p830_p4  ;;  %s216_s16 = int_to_ptr.vmem [resolvable:$true] %s215_s16 }
  0x15   : > { %p551_p1 = scmp.ge.s32.totalorder %s753_s23, 1  ;;  %p220_p2 = scmp.lt.s32.totalorder %s753_s23, 3 }
  0x16   : > { %s202_s24 = scalar_lea.sflag [#allocation4], %s201_s9  ;;  %p647_p3 = pneg %p860_p0 }
  0x17   : > { %s658_s25 = scalar_lea.vmem %s216_s16, 128  ;;  %s755_s27 = smov [#allocation3]  }
  0x18   : > { %p659_p5 = scmp.ne.s32.totalorder %s216_s16, %s658_s25  ;;  %s663_s29 = sshll.u32 %s755_s27, 4  ;;  %s664_s29 = int_to_ptr.vmem [resolvable:$false] %s663_s29 }
  0x19   : > { %s665_s10 = scalar_lea.vmem %s664_s29, 256  ;;  %p666_p10 = scmp.lt.s32.totalorder %s216_s16, %s664_s29 }
  0x1a   : > { %p661_p6 = pnand %p659_p5, %p647_p3  ;;  %p667_p12 = scmp.lt.s32.totalorder %s665_s10, %s658_s25 }
  0x1c   : > { %p662_p7 = pneg %p661_p6  ;;  %p668_p4 = por %p667_p12, %p666_p10 }
  0x1e   : > { %p669_p13 = pnand %p668_p4, %p662_p7 }
  0x20   : > { %672 = shalt.err (!%p669_p13)
}
  0x21   : > { %583 = dma.hbm_to_vmem [thread:$0]  (!%p860_p0), %s213_s14, 128, %s216_s16, %s202_s24  }
  0x22   : > { %p221_p11 = pnand %p551_p1, %p220_p2 }
  0x23   : > { %s875_s28 = sand.u32 (!%p221_p11), 1, %s737_s19  }
  0x24   : > { %224 = sbr.rel (%p221_p11) target bundleno = 627 (0x273), region = 40  ;;  %s552_s9 = sshll.u32 (!%p221_p11), %s875_s28, 3 }
  0x25   : > { %s227_s11 = scalar_lea.sflag (!%p221_p11), [#allocation4], %s875_s28  ;;  %s230_s12 = scalar_lea.vmem (!%p221_p11), [#allocation3], %s552_s9 }
  0x29   : > { %724 = dma.done.wait (%p836_p8), %s227_s11, 128  }
  0x2a   : > { %726 = vsyncadd (%p836_p8), %s227_s11, 4294967168  ;;  %vm273_vm0 = vcmask 1043456   ;;  %v262_v0 = vld [vmem:[%s230_s12] sm:$0xff]  ;;  %v756_v5 = vmov 0.0   ;;  %vm757_vm1 = vmmov 0   ;;  %v283_v7 = vlaneseq  ;;  %s558_s27 = sshll.u32 %s745_s21, 4 }
  0x2b   : > { %v271_v1 = vcombine.high %v262_v0, %v262_v0  ;;  %v274_v2 = vsel %vm273_vm0, %v262_v0, 0.0  ;;  %566 = vmatprep.subr.mxu0 %v756_v5  ;;  %v280_v6 = vld [vmem:[%s943_s1] sm:$0xf]  ;;  %571 = vmatprep.subr.mxu1 %v756_v5  ;;  %vm289_vm2 = vcmask 31744   ;;  %vm372_vm3 = vcmask 1041408   ;;  %s255_s29 = scalar_lea.vmem [#allocation6], %s875_s28  ;;  %s900_s12 = scalar_lea.hbm %s947_s5, %s558_s27 }
  0x2c   : > { %567 = vmatpush3.msk.msra.mxu0 %vm273_vm0, %v280_v6  ;;  %568 = vmatprep.mubr.msk.f32.mxu0 %vm757_vm1, %v756_v5  ;;  %v284_v8 = vand.u32 127, %v283_v7  ;;  %v286_v9 = vshrl.u32 %v283_v7, 7  ;;  %v366_v14 = vld [vmem:[%s945_s3] sm:$0x3]  ;;  %vm368_vm4 = vcmask 15360   ;;  %s467_s10 = sshll.u32 %s255_s29, 4  ;;  %s468_s10 = int_to_ptr.vmem [resolvable:$true] %s467_s10 }
  0x2d   : > { %v275_v3 = vsel %vm273_vm0, %v271_v1, 0.0  ;;  %573 = vmatprep.mubr.msk.f32.mxu1 %vm757_vm1, %v756_v5  ;;  %572 = vmatpush3.msk.msra.mxu1 %vm372_vm3, %v366_v14  ;;  %v281_v15 = vld [vmem:[%s944_s2] sm:$0x1]  ;;  %vm452_vm5 = vcmask 24576   ;;  %s455_s13 = scalar_lea.sflag [#allocation5], %s875_s28  ;;  %s673_s14 = scalar_lea.vmem %s468_s10, 16 }
  0x2e   : > { %v276_v4 = vadd.f32 %v275_v3, %v274_v2  ;;  %v287_v10 = vsub.s32 %v284_v8, %v286_v9  ;;  %v367_v20 = vld [vmem:[%s946_s4] sm:$0x1]  ;;  %p674_p8 = scmp.ne.s32.totalorder %s468_s10, %s673_s14  ;;  %s758_s30 = smov [#allocation6]  }
  0x2f   : > { %s677_s15 = sshll.u32 %s758_s30, 4  ;;  %s678_s15 = int_to_ptr.vmem [resolvable:$false] %s677_s15 }
  0x30   : > { %277 = vadd.xlane.f32.xlu0 %v276_v4  ;;  %p675_p11 = pnand %p674_p8, %p840_p9  ;;  %s679_s21 = scalar_lea.vmem %s678_s15, 32 }
  0x31   : > { %p680_p0 = scmp.lt.s32.totalorder %s468_s10, %s678_s15  ;;  %p681_p1 = scmp.lt.s32.totalorder %s679_s21, %s673_s14 }
  0x32   : > { %p676_p12 = pneg %p675_p11 }
  0x33   : > { %p682_p2 = por %p681_p1, %p680_p0 }
  0x35   : > { %p683_p3 = pnand %p682_p2, %p676_p12 }
  0xb9   : > { %v278_v11 = vpop.xlane.xlu0 %277 }
  0xba   : > { %v279_v12 = vmul.f32 0.00390625, %v278_v11 }
  0xbc   : > { %v288_v13 = vrot.slane %v279_v12, %v287_v10 }
  0xbe   : > { %569 = vmatmul.mubr.msk.f32.vlgmr.msra.gmra.mxu0 %vm289_vm2, %v288_v13 }
 0x17e   : > { %v361_v16 = vpop.f32.mrf.mxu0 }
 0x17f   : > { %v362_v17 = vadd.f32 %v361_v16, %v281_v15 }
 0x180   : > { %v570_v18 = vpop.f32.mrf.mxu0 }
 0x181   : > { %v365_v19 = vmax.f32 %v362_v17, 0.0 }
 0x183   : > { %574 = vmatmul.mubr.msk.f32.vlgmr.msra.gmra.mxu1 %vm368_vm4, %v365_v19 }
 0x243   : > { %v442_v21 = vpop.f32.mrf.mxu1 }
 0x244   : > { %v443_v22 = vadd.f32 %v442_v21, %v367_v20 }
 0x245   : > { %v575_v23 = vpop.f32.mrf.mxu1 }
 0x246   : > { %v557_v24 = vmul.f32 -1.442695, %v443_v22 }
 0x248   : > { %641 = vpow2.f32 %v557_v24 }
 0x255   : > { %v642_v25 = vpop.eup %641 }
 0x256   : > { %v449_v26 = vadd.f32 1.0, %v642_v25 }
 0x258   : > { %643 = vrcp.f32 %v449_v26 }
 0x265   : > { %v644_v27 = vpop.eup %643 }
 0x266   : > { %453 = vst.msk [vmem:[%s255_s29] sm:$0x1] %vm452_vm5, %v644_v27 }
 0x267   : > { %686 = shalt.err (!%p683_p3)
}
 0x268   : > { %s687_s16 = scalar_lea.hbm %s900_s12, 16  ;;  %s691_s24 = scalar_lea.hbm %s947_s5, 32 }
 0x269   : > { %p688_p5 = scmp.ne.s32.totalorder %s900_s12, %s687_s16  ;;  %p692_p10 = scmp.lt.s32.totalorder %s900_s12, %s947_s5 }
 0x26a   : > { %p693_p4 = scmp.lt.s32.totalorder %s691_s24, %s687_s16 }
 0x26b   : > { %p689_p6 = pnand %p688_p5, %p840_p9 }
 0x26c   : > { %p694_p13 = por %p693_p4, %p692_p10 }
 0x26d   : > { %p690_p7 = pneg %p689_p6 }
 0x26f   : > { %p695_p8 = pnand %p694_p13, %p690_p7 }
 0x271   : > { %698 = shalt.err (!%p695_p8)
}
 0x272   : > { %578 = dma.vmem_to_hbm [thread:$0]  (%p840_p9), %s468_s10, 16, %s900_s12, %s455_s13  }
 0x273 PF: > { %s479_s29 = sand.u32 1, %s733_s18   ;;  %p953_p11 = scmp.ne.s32.totalorder %s951_s8, 0 }
 0x274   : > { %p954_p12 = scmp.ge.s32.totalorder %s753_s23, 2  ;;  %s480_s9 = scalar_lea.sflag [#allocation5], %s479_s29 }
 0x276   : > { %p585_p0 = pnand %p954_p12, %p953_p11 }
 0x278   : > { %p586_p1 = pneg %p585_p0 }
 0x27a   : > { %728 = dma.done.wait (%p586_p1), %s480_s9, 16  }
 0x27b   : > { %730 = vsyncadd (%p586_p1), %s480_s9, 4294967280  ;;  %s21_s23 = sadd.s32 1, %s753_s23   ;;  %s955_s18 = smov %s737_s19 }
 0x27c   : > { %p18_p2 = scmp.ge.s32.totalorder %s21_s23, 4   ;;  %s956_s19 = smov %s741_s20 }
 0x27d   : > { %s957_s20 = smov %s845_s7  ;;  %s958_s21 = smov %s749_s22 }
 0x27e   : > { %s959_s22 = smov %s961_s26  ;;  %20 = sbr.rel (!%p18_p2) target bundleno = 6 (0x6), region = 93 }
 0x283   :  { %484 = vsyncpa [#allocation4], 1 }
 0x284   :  { %486 = vsyncpa [#allocation4 + $0x1], 1 }
 0x285   :  { %487 = vsyncpa [#allocation5], 1 }
 0x286   :  { %489 = vsyncpa [#allocation5 + $0x1], 1 }

</bundles_post_ra>
